<compile_context>
chip_gen: v5e
topology: v5e:2x2
jax: 0.10.0
libtpu: 0.0.40
codegen_flags: <defaults>
</compile_context>

<pallas_src>
import functools

import jax
import jax.numpy as jnp
from jax.experimental import pallas as pl
from jax.experimental.pallas import tpu as pltpu

HIDDEN = 256
LANE = 128
SUBLANE = 8


def _round_up(x: int, m: int) -> int:
    return ((x + m - 1) // m) * m


def actor_td3_kernel(s_ref, w1_ref, b1_ref, w2_ref, b2_ref, w3_ref, b3_ref,
                     o_ref, *, max_action: float):
    # fc1 + relu  (bf16 operands on the MXU, f32 accumulation)
    h1 = jnp.dot(s_ref[...].astype(jnp.bfloat16), w1_ref[...],
                 preferred_element_type=jnp.float32)
    h1 = jnp.maximum(h1 + b1_ref[...], 0.0)
    # fc2 + relu
    h2 = jnp.dot(h1.astype(jnp.bfloat16), w2_ref[...],
                 preferred_element_type=jnp.float32)
    h2 = jnp.maximum(h2 + b2_ref[...], 0.0)
    # fc3 + tanh, scale by max_action
    h3 = jnp.dot(h2.astype(jnp.bfloat16), w3_ref[...],
                 preferred_element_type=jnp.float32)
    h3 = jnp.tanh(h3 + b3_ref[...])
    o_ref[...] = (h3 * max_action).astype(o_ref.dtype)  # bf16 store -> half writeback


def prepare_params(params):
    """One-time conversion to kernel layout.

    Does the bf16 casts and the 128-lane padding of fc3 exactly once, so the
    hot forward path does not emit convert/pad ops in XLA on every call.
    Call this once per parameter update and reuse the result."""
    action_dim = int(params["w3"].shape[1])
    act_pad = _round_up(action_dim, LANE)
    w3 = params["w3"].astype(jnp.bfloat16)
    b3 = params["b3"].astype(jnp.float32)
    if act_pad != action_dim:
        w3 = jnp.pad(w3, ((0, 0), (0, act_pad - action_dim)))
        b3 = jnp.pad(b3, ((0, 0), (0, act_pad - action_dim)))
    return {
        "w1": params["w1"].astype(jnp.bfloat16),
        "b1": params["b1"].astype(jnp.float32),
        "w2": params["w2"].astype(jnp.bfloat16),
        "b2": params["b2"].astype(jnp.float32),
        "w3": w3,
        "b3": b3,
        "action_dim": action_dim,
    }


def _batch_tiling(B: int):
    """Return (padded_b, tm) with padded_b % tm == 0."""
    padded_b = _round_up(B, SUBLANE)
    if padded_b < 2 * SUBLANE:
        # Too small to split usefully: single tile, single grid step.
        return padded_b, padded_b
    if padded_b <= 1024:
        # Force grid=(2,) so the "parallel" axis shards across both v7x
        # TensorCores even at small/medium batch (weights duplicated per core
        # for free at this size).
        tm = _round_up((padded_b + 1) // 2, SUBLANE)
        return 2 * tm, tm
    # Large batch: big tiles amortize per-grid-step overhead (~0.35 us/step).
    # VMEM per step (state + out tiles, double-buffered) stays ~1-2 MB,
    # far under every generation's scoped-VMEM limit.
    tm = 512
    return _round_up(padded_b, tm), tm


def actor_td3_forward(state, prepared, max_action: float):
    """state: [B, state_dim] f32. prepared: output of prepare_params()."""
    B, state_dim = state.shape
    action_dim = prepared["action_dim"]
    act_pad = prepared["w3"].shape[1]

    padded_b, tm = _batch_tiling(B)
    if padded_b != B:
        state = jnp.pad(state, ((0, padded_b - B), (0, 0)))

    grid = (padded_b // tm,)

    const = lambda i: (0, 0)  # resident operands: same block every grid step
    # NOTE: pipeline_mode=pl.Buffered(1) on the constant operands would save a
    # second (unused) pipeline buffer (~200 KB); omitted as pure VMEM hygiene.
    in_specs = [
        pl.BlockSpec((tm, state_dim), lambda i: (i, 0)),   # state tile
        pl.BlockSpec((state_dim, HIDDEN), const),          # w1 (bf16)
        pl.BlockSpec((1, HIDDEN), const),                  # b1 (f32)
        pl.BlockSpec((HIDDEN, HIDDEN), const),             # w2 (bf16)
        pl.BlockSpec((1, HIDDEN), const),                  # b2 (f32)
        pl.BlockSpec((HIDDEN, act_pad), const),            # w3 (bf16, padded)
        pl.BlockSpec((1, act_pad), const),                 # b3 (f32, padded)
    ]
    out_specs = pl.BlockSpec((tm, act_pad), lambda i: (i, 0))

    flops = 2 * padded_b * (state_dim * HIDDEN + HIDDEN * HIDDEN + HIDDEN * act_pad)
    bytes_accessed = (
        padded_b * state_dim * 4                                          # state (f32)
        + (state_dim * HIDDEN + HIDDEN * HIDDEN + HIDDEN * act_pad) * 2   # bf16 weights
        + (2 * HIDDEN + act_pad) * 4                                      # f32 biases
        + padded_b * act_pad * 2                                          # output (bf16)
    )

    kernel = functools.partial(actor_td3_kernel, max_action=max_action)

    out = pl.pallas_call(
        kernel,
        out_shape=jax.ShapeDtypeStruct((padded_b, act_pad), jnp.bfloat16),
        grid=grid,
        in_specs=in_specs,
        out_specs=out_specs,
        compiler_params=pltpu.CompilerParams(
            dimension_semantics=("parallel",)),
        cost_estimate=pl.CostEstimate(
            flops=flops,
            transcendentals=padded_b * act_pad,
            bytes_accessed=bytes_accessed),
    )(state, prepared["w1"], prepared["b1"], prepared["w2"], prepared["b2"],
      prepared["w3"], prepared["b3"])

    return out[:B, :action_dim].astype(jnp.float32)


def init_params(key, state_dim: int, action_dim: int):
    """PyTorch nn.Linear default init U(-1/sqrt(fan_in), 1/sqrt(fan_in)).

    Weights stored as [in_features, out_features] (transposed vs. torch)."""
    ks = jax.random.split(key, 6)

    def uniform(k, shape, fan_in):
        bound = 1.0 / jnp.sqrt(jnp.float32(fan_in))
        return jax.random.uniform(k, shape, jnp.float32, -bound, bound)

    return {
        "w1": uniform(ks[0], (state_dim, HIDDEN), state_dim),
        "b1": uniform(ks[1], (1, HIDDEN), state_dim),
        "w2": uniform(ks[2], (HIDDEN, HIDDEN), HIDDEN),
        "b2": uniform(ks[3], (1, HIDDEN), HIDDEN),
        "w3": uniform(ks[4], (HIDDEN, action_dim), HIDDEN),
        "b3": uniform(ks[5], (1, action_dim), HIDDEN),
    }


def reference_forward(state, params, max_action: float):
    # Mirrors the kernel's numerics: bf16 matmul operands, f32 accumulation,
    # f32 bias-add / relu / tanh / scale, bf16 output store.
    w1 = params["w1"].astype(jnp.bfloat16)
    w2 = params["w2"].astype(jnp.bfloat16)
    w3 = params["w3"].astype(jnp.bfloat16)
    h1 = jnp.dot(state.astype(jnp.bfloat16), w1,
                 preferred_element_type=jnp.float32) + params["b1"]
    h1 = jnp.maximum(h1, 0.0)
    h2 = jnp.dot(h1.astype(jnp.bfloat16), w2,
                 preferred_element_type=jnp.float32) + params["b2"]
    h2 = jnp.maximum(h2, 0.0)
    h3 = jnp.dot(h2.astype(jnp.bfloat16), w3,
                 preferred_element_type=jnp.float32) + params["b3"]
    out = jnp.tanh(h3) * max_action
    return out.astype(jnp.bfloat16).astype(jnp.float32)


if __name__ == "__main__":
    key = jax.random.PRNGKey(0)
    k_params, k_state = jax.random.split(key)

    batch = 2
    state_dim = 16
    action_dim = 8
    max_action = 2.0

    params = init_params(k_params, state_dim, action_dim)
    prepared = prepare_params(params)            # one-time kernel-layout conversion
    state = jax.random.normal(k_state, (batch, state_dim), jnp.float32)

    out = actor_td3_forward(state, prepared, max_action)
    out = jax.block_until_ready(out)

    ref = reference_forward(state, params, max_action)
    assert out.shape == (batch, action_dim), out.shape
    assert jnp.allclose(out, ref, atol=2e-2, rtol=2e-2), "mismatch vs reference"

    print("KERNEL_OK")
</pallas_src>

<mosaic_0001>
module attributes {stable_mosaic.version = 11 : i64} {
  func.func @actor_td3_kernel(%arg0: i32, %arg1: memref<8x16xf32, #tpu.memory_space<vmem>>, %arg2: memref<16x256xbf16, #tpu.memory_space<vmem>>, %arg3: memref<1x256xf32, #tpu.memory_space<vmem>>, %arg4: memref<256x256xbf16, #tpu.memory_space<vmem>>, %arg5: memref<1x256xf32, #tpu.memory_space<vmem>>, %arg6: memref<256x128xbf16, #tpu.memory_space<vmem>>, %arg7: memref<1x128xf32, #tpu.memory_space<vmem>>, %arg8: memref<8x128xbf16, #tpu.memory_space<vmem>>) attributes {dimension_semantics = [#tpu.dimension_semantics<parallel>], iteration_bounds = array<i64: 1>, scalar_prefetch = 0 : i64, scratch_operands = 0 : i64, tpu.core_type = #tpu.core_type<tc>, window_params = [{transform_indices = @transform_0, window_bounds = array<i64: 8, 16>}, {pipeline_mode = #tpu.pipeline_mode<synchronous>, transform_indices = @transform_1, window_bounds = array<i64: 16, 256>}, {pipeline_mode = #tpu.pipeline_mode<synchronous>, transform_indices = @transform_2, window_bounds = array<i64: 1, 256>}, {pipeline_mode = #tpu.pipeline_mode<synchronous>, transform_indices = @transform_3, window_bounds = array<i64: 256, 256>}, {pipeline_mode = #tpu.pipeline_mode<synchronous>, transform_indices = @transform_4, window_bounds = array<i64: 1, 256>}, {pipeline_mode = #tpu.pipeline_mode<synchronous>, transform_indices = @transform_5, window_bounds = array<i64: 256, 128>}, {pipeline_mode = #tpu.pipeline_mode<synchronous>, transform_indices = @transform_6, window_bounds = array<i64: 1, 128>}, {transform_indices = @transform_7, window_bounds = array<i64: 8, 128>}]} {
    %c0 = arith.constant 0 : index
    %c0_0 = arith.constant 0 : index
    %0 = vector.load %arg1[%c0, %c0_0] : memref<8x16xf32, #tpu.memory_space<vmem>>, vector<8x16xf32>
    %1 = arith.truncf %0 : vector<8x16xf32> to vector<8x16xbf16>
    %c0_1 = arith.constant 0 : index
    %c0_2 = arith.constant 0 : index
    %2 = vector.load %arg2[%c0_1, %c0_2] : memref<16x256xbf16, #tpu.memory_space<vmem>>, vector<16x256xbf16>
    %cst = arith.constant dense<0.000000e+00> : vector<8x256xf32>
    %3 = tpu.matmul %1, %2, %cst {dimension_numbers = #tpu.dot_dimension_numbers<[1], [0], [0], [1], [0, 0, 1, 1], [], []>} : vector<8x16xbf16>, vector<16x256xbf16>, vector<8x256xf32> -> vector<8x256xf32>
    %c0_3 = arith.constant 0 : index
    %c0_4 = arith.constant 0 : index
    %4 = vector.load %arg3[%c0_3, %c0_4] : memref<1x256xf32, #tpu.memory_space<vmem>>, vector<1x256xf32>
    %5 = vector.broadcast %4 : vector<1x256xf32> to vector<8x256xf32>
    %6 = arith.addf %3, %5 : vector<8x256xf32>
    %cst_5 = arith.constant 0.000000e+00 : f32
    %7 = vector.broadcast %cst_5 : f32 to vector<8x256xf32>
    %8 = arith.maximumf %6, %7 : vector<8x256xf32>
    %9 = arith.truncf %8 : vector<8x256xf32> to vector<8x256xbf16>
    %c0_6 = arith.constant 0 : index
    %c0_7 = arith.constant 0 : index
    %10 = vector.load %arg4[%c0_6, %c0_7] : memref<256x256xbf16, #tpu.memory_space<vmem>>, vector<256x256xbf16>
    %cst_8 = arith.constant dense<0.000000e+00> : vector<8x256xf32>
    %11 = tpu.matmul %9, %10, %cst_8 {dimension_numbers = #tpu.dot_dimension_numbers<[1], [0], [0], [1], [0, 0, 1, 1], [], []>} : vector<8x256xbf16>, vector<256x256xbf16>, vector<8x256xf32> -> vector<8x256xf32>
    %c0_9 = arith.constant 0 : index
    %c0_10 = arith.constant 0 : index
    %12 = vector.load %arg5[%c0_9, %c0_10] : memref<1x256xf32, #tpu.memory_space<vmem>>, vector<1x256xf32>
    %13 = vector.broadcast %12 : vector<1x256xf32> to vector<8x256xf32>
    %14 = arith.addf %11, %13 : vector<8x256xf32>
    %cst_11 = arith.constant 0.000000e+00 : f32
    %15 = vector.broadcast %cst_11 : f32 to vector<8x256xf32>
    %16 = arith.maximumf %14, %15 : vector<8x256xf32>
    %17 = arith.truncf %16 : vector<8x256xf32> to vector<8x256xbf16>
    %c0_12 = arith.constant 0 : index
    %c0_13 = arith.constant 0 : index
    %18 = vector.load %arg6[%c0_12, %c0_13] : memref<256x128xbf16, #tpu.memory_space<vmem>>, vector<256x128xbf16>
    %cst_14 = arith.constant dense<0.000000e+00> : vector<8x128xf32>
    %19 = tpu.matmul %17, %18, %cst_14 {dimension_numbers = #tpu.dot_dimension_numbers<[1], [0], [0], [1], [0, 0, 1, 1], [], []>} : vector<8x256xbf16>, vector<256x128xbf16>, vector<8x128xf32> -> vector<8x128xf32>
    %c0_15 = arith.constant 0 : index
    %c0_16 = arith.constant 0 : index
    %20 = vector.load %arg7[%c0_15, %c0_16] : memref<1x128xf32, #tpu.memory_space<vmem>>, vector<1x128xf32>
    %21 = vector.broadcast %20 : vector<1x128xf32> to vector<8x128xf32>
    %22 = arith.addf %19, %21 : vector<8x128xf32>
    %23 = math.tanh %22 : vector<8x128xf32>
    %cst_17 = arith.constant 2.000000e+00 : f32
    %24 = vector.broadcast %cst_17 : f32 to vector<8x128xf32>
    %25 = arith.mulf %23, %24 : vector<8x128xf32>
    %26 = arith.truncf %25 : vector<8x128xf32> to vector<8x128xbf16>
    %c0_18 = arith.constant 0 : index
    %c0_19 = arith.constant 0 : index
    %27 = vector.load %arg8[%c0_18, %c0_19] : memref<8x128xbf16, #tpu.memory_space<vmem>>, vector<8x128xbf16>
    tpu.vector_store %arg8[%c0_18, %c0_19], %26 {strides = array<i32>} : memref<8x128xbf16, #tpu.memory_space<vmem>>, vector<8x128xbf16>,
    return
  }
  func.func @transform_0(%arg0: i32) -> (i32, i32) {
    %c0_i32 = arith.constant 0 : i32
    %c0_i32_0 = arith.constant 0 : i32
    return %arg0, %c0_i32 : i32, i32
  }
  func.func @transform_1(%arg0: i32) -> (i32, i32) {
    %c0_i32 = arith.constant 0 : i32
    %c0_i32_0 = arith.constant 0 : i32
    %c0_i32_1 = arith.constant 0 : i32
    return %c0_i32, %c0_i32_0 : i32, i32
  }
  func.func @transform_2(%arg0: i32) -> (i32, i32) {
    %c0_i32 = arith.constant 0 : i32
    %c0_i32_0 = arith.constant 0 : i32
    %c0_i32_1 = arith.constant 0 : i32
    return %c0_i32, %c0_i32_0 : i32, i32
  }
  func.func @transform_3(%arg0: i32) -> (i32, i32) {
    %c0_i32 = arith.constant 0 : i32
    %c0_i32_0 = arith.constant 0 : i32
    %c0_i32_1 = arith.constant 0 : i32
    return %c0_i32, %c0_i32_0 : i32, i32
  }
  func.func @transform_4(%arg0: i32) -> (i32, i32) {
    %c0_i32 = arith.constant 0 : i32
    %c0_i32_0 = arith.constant 0 : i32
    %c0_i32_1 = arith.constant 0 : i32
    return %c0_i32, %c0_i32_0 : i32, i32
  }
  func.func @transform_5(%arg0: i32) -> (i32, i32) {
    %c0_i32 = arith.constant 0 : i32
    %c0_i32_0 = arith.constant 0 : i32
    %c0_i32_1 = arith.constant 0 : i32
    return %c0_i32, %c0_i32_0 : i32, i32
  }
  func.func @transform_6(%arg0: i32) -> (i32, i32) {
    %c0_i32 = arith.constant 0 : i32
    %c0_i32_0 = arith.constant 0 : i32
    %c0_i32_1 = arith.constant 0 : i32
    return %c0_i32, %c0_i32_0 : i32, i32
  }
  func.func @transform_7(%arg0: i32) -> (i32, i32) {
    %c0_i32 = arith.constant 0 : i32
    %c0_i32_0 = arith.constant 0 : i32
    return %arg0, %c0_i32 : i32, i32
  }
}

</mosaic_0001>

<bundles_post_ra>
// kernel: tpu_custom_call.1
= control target key start
LH: loop header
LB: loop body
LE: loop exit
PB: predicated region body
PF: predicated region fallthrough
CT: control target
= control target key end

     0   :  { %12 = vsyncpa [#allocation3], 0  ;;  %s1084_s0 = inlined_call_operand.hbm [shape: f32[8,16], index: 0, kind: input, shape index: {}]   ;;  %s1085_s1 = inlined_call_operand.hbm [shape: bf16[16,256], index: 1, kind: input, shape index: {}]   ;;  %s1086_s2 = inlined_call_operand.hbm [shape: f32[1,256], index: 2, kind: input, shape index: {}]   ;;  %s1087_s3 = inlined_call_operand.hbm [shape: bf16[256,256], index: 3, kind: input, shape index: {}]   ;;  %s1088_s4 = inlined_call_operand.vmem [shape: f32[1,256], index: 4, kind: input, shape index: {}]   ;;  %s1089_s5 = inlined_call_operand.hbm [shape: bf16[256,128], index: 5, kind: input, shape index: {}]   ;;  %s1090_s6 = inlined_call_operand.vmem [shape: f32[1,128], index: 6, kind: input, shape index: {}]   ;;  %s1091_s7 = inlined_call_operand.hbm [shape: bf16[8,128], index: 7, kind: output, shape index: {}]  }
   0x1   :  { %13 = vsyncpa [#allocation6], 0 }
   0x2   :  { %14 = vsyncpa [#allocation9], 0  ;;  %s31_s26 = sshll.u32 %s1085_s1, 4  ;;  %s32_s26 = int_to_ptr.hbm [resolvable:$true] %s31_s26 }
   0x3   :  { %15 = vsyncpa [#allocation4], 0  ;;  %s1008_s27 = smov [#allocation5]   ;;  %s55_s8 = sshll.u32 %s1087_s3, 4  ;;  %s56_s8 = int_to_ptr.hbm [resolvable:$true] %s55_s8 }
   0x4   :  { %s33_s28 = sshll.u32 %s1008_s27, 4  ;;  %s1009_s9 = smov 128   ;;  %s34_s28 = int_to_ptr.vmem [resolvable:$true] %s33_s28 }
   0x5   :  { %s1010_s10 = smov 8   ;;  %s1011_s11 = smov [#allocation8]  }
   0x6   :  { %39 = dma.hbm_to_vmem [thread:$0]  %s32_s26, 256, %s34_s28, [#allocation6], %s1009_s9, %s1009_s9, %s1010_s10  }
   0x7   :  { %s57_s12 = sshll.u32 %s1011_s11, 4  ;;  %s21_s15 = sshll.u32 %s1084_s0, 4  ;;  %s58_s12 = int_to_ptr.vmem [resolvable:$true] %s57_s12  ;;  %s22_s15 = int_to_ptr.hbm [resolvable:$true] %s21_s15 }
   0x8   :  { %63 = dma.hbm_to_vmem [thread:$0]  %s56_s8, 4096, %s58_s12, [#allocation9], %s1009_s9, %s1009_s9, %s1010_s10  }
   0x9   :  { %s45_s17 = sshll.u32 %s1086_s2, 4  ;;  %s1012_s18 = smov [#allocation2]   ;;  %s46_s17 = int_to_ptr.hbm [resolvable:$true] %s45_s17 }
   0xa   :  { %s23_s19 = sshll.u32 %s1012_s18, 4  ;;  %s1013_s3 = smov [#allocation7]   ;;  %s24_s19 = int_to_ptr.vmem [resolvable:$true] %s23_s19 }
   0xb   :  { %26 = dma.hbm_to_vmem [thread:$0]  %s22_s15, 128, %s24_s19, [#allocation3]  }
   0xc   :  { %s47_s20 = sshll.u32 %s1013_s3, 4  ;;  %s70_s23 = sshll.u32 %s1089_s5, 4  ;;  %s48_s20 = int_to_ptr.vmem [resolvable:$true] %s47_s20  ;;  %s71_s23 = int_to_ptr.hbm [resolvable:$true] %s70_s23 }
   0xd   :  { %50 = dma.hbm_to_vmem [thread:$0]  %s46_s17, 32, %s48_s20, [#allocation6]  }
   0xe   :  { %s1014_s0 = smov [#allocation10]   ;;  %s1015_s25 = smov 64  }
   0xf   :  { %s72_s24 = sshll.u32 %s1014_s0, 4  ;;  %s1016_s26 = smov 4   ;;  %s73_s24 = int_to_ptr.vmem [resolvable:$true] %s72_s24 }
  0x10   :  { %78 = dma.hbm_to_vmem [thread:$0]  %s71_s23, 2048, %s73_s24, [#allocation9], %s1015_s25, %s1015_s25, %s1016_s26  }
  0x11   :  { %1000 = dma.done.wait [#allocation3], 128  }
  0x12   :  { %1001 = vsyncadd [#allocation3], 4294967168 }
  0x13   :  { %1002 = dma.done.wait [#allocation6], 288  }
  0x14   :  { %1003 = vsyncadd [#allocation6], 4294967008 }
  0x15   :  { %1004 = dma.done.wait [#allocation9], 6144  }
  0x16   :  { %1005 = vsyncadd [#allocation9], 4294961152  ;;  %v593_v0 = vld [vmem:[#allocation5] sm:$0xf]  ;;  %v794_v1 = vld [vmem:[#allocation5 + $0x4] sm:$0xf0] }
  0x17   :  { %v793_v2 = vld [vmem:[#allocation5 + $0x4] sm:$0xf]  ;;  %v594_v3 = vor.u32 %v794_v1, %v593_v0  ;;  %v595_v4 = vld [vmem:[#allocation5 + $0x8] sm:$0xf0]  ;;  %v102_v5 = vld [vmem:[#allocation2] sm:$0xff]  ;;  %vm122_vm0 = vcmask 130048  }
  0x18   :  { %v659_v6 = vld [vmem:[#allocation8 + $0x70] sm:$0xf]  ;;  %v598_v7 = vor.u32 %v793_v2, %v595_v4  ;;  %v103_v8 = vpack.c.bf16 %v102_v5, %v102_v5  ;;  %v810_v9 = vld [vmem:[#allocation8 + $0x74] sm:$0xf0]  ;;  %v809_v14 = vld [vmem:[#allocation8 + $0x74] sm:$0xf] }
  0x19   :  { %v723_v10 = vld [vmem:[#allocation8 + $0xf0] sm:$0xf]  ;;  %v826_v11 = vld [vmem:[#allocation8 + $0xf4] sm:$0xf0]  ;;  %133 = vmatpush.bf16.msra.mxu0 %v594_v3  ;;  %v660_v12 = vor.u32 %v810_v9, %v659_v6  ;;  %v661_v15 = vld [vmem:[#allocation8 + $0x78] sm:$0xf0] }
  0x1a   :  { %v724_v13 = vor.u32 %v826_v11, %v723_v10  ;;  %v825_v16 = vld [vmem:[#allocation8 + $0xf4] sm:$0xf]  ;;  %146 = vmatpush.bf16.msra.mxu1 %v598_v7  ;;  %v664_v17 = vor.u32 %v809_v14, %v661_v15  ;;  %v725_v18 = vld [vmem:[#allocation8 + $0xf8] sm:$0xf0]  ;;  %v651_v19 = vld [vmem:[#allocation8 + $0x60] sm:$0xf] }
  0x1b   :  { %v808_v20 = vld [vmem:[#allocation8 + $0x64] sm:$0xf0]  ;;  %354 = vmatpush.bf16.msra.mxu2 %v660_v12  ;;  %v728_v21 = vor.u32 %v825_v16, %v725_v18  ;;  %v715_v23 = vld [vmem:[#allocation8 + $0xe0] sm:$0xf]  ;;  %v807_v25 = vld [vmem:[#allocation8 + $0x64] sm:$0xf] }
  0x1c   :  { %367 = vmatpush.bf16.msra.mxu3 %v724_v13  ;;  %v652_v22 = vor.u32 %v808_v20, %v651_v19  ;;  %v824_v24 = vld [vmem:[#allocation8 + $0xe4] sm:$0xf0]  ;;  %599 = vmatmul.msk.bf16.vlgmr.msra.gmra.mxu0 %vm122_vm0, %v103_v8  ;;  %v653_v27 = vld [vmem:[#allocation8 + $0x68] sm:$0xf0]  ;;  %v823_v28 = vld [vmem:[#allocation8 + $0xe4] sm:$0xf] }
  0x1d   :  { %v716_v26 = vor.u32 %v824_v24, %v715_v23  ;;  %v717_v29 = vld [vmem:[#allocation8 + $0xe8] sm:$0xf0]  ;;  %600 = vmatmul.msk.bf16.vlgmr.msra.gmra.mxu1 %vm122_vm0, %v103_v8  ;;  %380 = vmatpush.bf16.msrb.mxu0 %v664_v17  ;;  %v656_v30 = vor.u32 %v807_v25, %v653_v27  ;;  %v643_v31 = vld [vmem:[#allocation8 + $0x50] sm:$0xf]  ;;  %v806_v32 = vld [vmem:[#allocation8 + $0x54] sm:$0xf0] }
  0x1e   :  { %v707_v33 = vld [vmem:[#allocation8 + $0xd0] sm:$0xf]  ;;  %393 = vmatpush.bf16.msrb.mxu1 %v728_v21  ;;  %v720_v34 = vor.u32 %v823_v28, %v717_v29  ;;  %v822_v35 = vld [vmem:[#allocation8 + $0xd4] sm:$0xf0]  ;;  %v805_v36 = vld [vmem:[#allocation8 + $0x54] sm:$0xf]  ;;  %v644_v38 = vor.u32 %v806_v32, %v643_v31 }
  0x1f   :  { %v645_v37 = vld [vmem:[#allocation8 + $0x58] sm:$0xf0]  ;;  %355 = vmatpush.bf16.msra.mxu2 %v652_v22  ;;  %v708_v39 = vor.u32 %v822_v35, %v707_v33  ;;  %v821_v40 = vld [vmem:[#allocation8 + $0xd4] sm:$0xf]  ;;  %v635_v42 = vld [vmem:[#allocation8 + $0x40] sm:$0xf] }
  0x20   :  { %368 = vmatpush.bf16.msra.mxu3 %v716_v26  ;;  %v709_v41 = vld [vmem:[#allocation8 + $0xd8] sm:$0xf0]  ;;  %v804_v43 = vld [vmem:[#allocation8 + $0x44] sm:$0xf0]  ;;  %v699_v44 = vld [vmem:[#allocation8 + $0xc0] sm:$0xf]  ;;  %v648_v46 = vor.u32 %v805_v36, %v645_v37 }
  0x21   :  { %v820_v45 = vld [vmem:[#allocation8 + $0xc4] sm:$0xf0]  ;;  %381 = vmatpush.bf16.msrb.mxu0 %v656_v30  ;;  %v712_v47 = vor.u32 %v821_v40, %v709_v41  ;;  %v803_v48 = vld [vmem:[#allocation8 + $0x44] sm:$0xf]  ;;  %v637_v49 = vld [vmem:[#allocation8 + $0x48] sm:$0xf0]  ;;  %v636_v50 = vor.u32 %v804_v43, %v635_v42 }
  0x22   :  { %394 = vmatpush.bf16.msrb.mxu1 %v720_v34  ;;  %v700_v51 = vor.u32 %v820_v45, %v699_v44  ;;  %v819_v52 = vld [vmem:[#allocation8 + $0xc4] sm:$0xf]  ;;  %v701_v53 = vld [vmem:[#allocation8 + $0xc8] sm:$0xf0]  ;;  %v627_v54 = vld [vmem:[#allocation8 + $0x30] sm:$0xf]  ;;  %v640_v58 = vor.u32 %v803_v48, %v637_v49 }
  0x23   :  { %356 = vmatpush.bf16.msra.mxu2 %v644_v38  ;;  %v802_v55 = vld [vmem:[#allocation8 + $0x34] sm:$0xf0]  ;;  %v691_v56 = vld [vmem:[#allocation8 + $0xb0] sm:$0xf]  ;;  %v704_v59 = vor.u32 %v819_v52, %v701_v53  ;;  %v801_v60 = vld [vmem:[#allocation8 + $0x34] sm:$0xf] }
  0x24   :  { %369 = vmatpush.bf16.msra.mxu3 %v708_v39  ;;  %v818_v57 = vld [vmem:[#allocation8 + $0xb4] sm:$0xf0]  ;;  %v629_v61 = vld [vmem:[#allocation8 + $0x38] sm:$0xf0]  ;;  %v817_v62 = vld [vmem:[#allocation8 + $0xb4] sm:$0xf]  ;;  %v628_v63 = vor.u32 %v802_v55, %v627_v54 }
  0x25   :  { %382 = vmatpush.bf16.msrb.mxu0 %v648_v46  ;;  %v692_v0 = vor.u32 %v818_v57, %v691_v56  ;;  %v693_v1 = vld [vmem:[#allocation8 + $0xb8] sm:$0xf0]  ;;  %v619_v2 = vld [vmem:[#allocation8 + $0x20] sm:$0xf]  ;;  %v800_v3 = vld [vmem:[#allocation8 + $0x24] sm:$0xf0]  ;;  %v632_v6 = vor.u32 %v801_v60, %v629_v61 }
  0x26   :  { %395 = vmatpush.bf16.msrb.mxu1 %v712_v47  ;;  %v683_v4 = vld [vmem:[#allocation8 + $0xa0] sm:$0xf]  ;;  %v816_v5 = vld [vmem:[#allocation8 + $0xa4] sm:$0xf0]  ;;  %v696_v7 = vor.u32 %v817_v62, %v693_v1  ;;  %v799_v8 = vld [vmem:[#allocation8 + $0x24] sm:$0xf]  ;;  %v620_v10 = vor.u32 %v800_v3, %v619_v2 }
  0x27   :  { %357 = vmatpush.bf16.msra.mxu2 %v636_v50  ;;  %v621_v9 = vld [vmem:[#allocation8 + $0x28] sm:$0xf0]  ;;  %v684_v11 = vor.u32 %v816_v5, %v683_v4  ;;  %v815_v12 = vld [vmem:[#allocation8 + $0xa4] sm:$0xf]  ;;  %v611_v16 = vld [vmem:[#allocation8 + $0x10] sm:$0xf] }
  0x28   :  { %370 = vmatpush.bf16.msra.mxu3 %v700_v51  ;;  %v685_v13 = vld [vmem:[#allocation8 + $0xa8] sm:$0xf0]  ;;  %v624_v14 = vor.u32 %v799_v8, %v621_v9  ;;  %v798_v17 = vld [vmem:[#allocation8 + $0x14] sm:$0xf0]  ;;  %v675_v18 = vld [vmem:[#allocation8 + $0x90] sm:$0xf] }
  0x29   :  { %383 = vmatpush.bf16.msrb.mxu0 %v640_v58  ;;  %v688_v15 = vor.u32 %v815_v12, %v685_v13  ;;  %v612_v19 = vor.u32 %v798_v17, %v611_v16  ;;  %v814_v20 = vld [vmem:[#allocation8 + $0x94] sm:$0xf0]  ;;  %v797_v21 = vld [vmem:[#allocation8 + $0x14] sm:$0xf]  ;;  %v613_v22 = vld [vmem:[#allocation8 + $0x18] sm:$0xf0] }
  0x2a   :  { %396 = vmatpush.bf16.msrb.mxu1 %v704_v59  ;;  %v676_v23 = vor.u32 %v814_v20, %v675_v18  ;;  %v616_v24 = vor.u32 %v797_v21, %v613_v22  ;;  %v813_v25 = vld [vmem:[#allocation8 + $0x94] sm:$0xf]  ;;  %v677_v26 = vld [vmem:[#allocation8 + $0x98] sm:$0xf0]  ;;  %v603_v28 = vld [vmem:[#allocation8] sm:$0xf] }
  0x2b   :  { %358 = vmatpush.bf16.msra.mxu2 %v628_v63  ;;  %v680_v27 = vor.u32 %v813_v25, %v677_v26  ;;  %v796_v29 = vld [vmem:[#allocation8 + $0x4] sm:$0xf0]  ;;  %v667_v30 = vld [vmem:[#allocation8 + $0x80] sm:$0xf]  ;;  %v795_v33 = vld [vmem:[#allocation8 + $0x4] sm:$0xf] }
  0x2c   :  { %371 = vmatpush.bf16.msra.mxu3 %v692_v0  ;;  %v604_v31 = vor.u32 %v796_v29, %v603_v28  ;;  %v812_v32 = vld [vmem:[#allocation8 + $0x84] sm:$0xf0]  ;;  %v605_v34 = vld [vmem:[#allocation8 + $0x8] sm:$0xf0]  ;;  %v811_v37 = vld [vmem:[#allocation8 + $0x84] sm:$0xf] }
  0x2d   :  { %384 = vmatpush.bf16.msrb.mxu0 %v632_v6  ;;  %v668_v35 = vor.u32 %v812_v32, %v667_v30  ;;  %v608_v36 = vor.u32 %v795_v33, %v605_v34  ;;  %v669_v38 = vld [vmem:[#allocation8 + $0x88] sm:$0xf0]  ;;  %v842_v40 = vld [vmem:[#allocation10 + $0x78] sm:$0xff]  ;;  %v841_v42 = vld [vmem:[#allocation10 + $0x70] sm:$0xff]  ;;  %s1017_s28 = smov [#allocation11]   ;;  %s579_s9 = sshll.u32 %s1091_s7, 4  ;;  %s580_s9 = int_to_ptr.hbm [resolvable:$true] %s579_s9 }
  0x2e   :  { %397 = vmatpush.bf16.msrb.mxu1 %v696_v7  ;;  %v672_v39 = vor.u32 %v811_v37, %v669_v38  ;;  %v834_v41 = vld [vmem:[#allocation10 + $0x38] sm:$0xff]  ;;  %v833_v43 = vld [vmem:[#allocation10 + $0x30] sm:$0xff]  ;;  %v840_v44 = vld [vmem:[#allocation10 + $0x68] sm:$0xff]  ;;  %s577_s29 = sshll.u32 %s1017_s28, 4  ;;  %s578_s29 = int_to_ptr.vmem [resolvable:$true] %s577_s29 }
  0x2f   :  { %359 = vmatpush.bf16.msra.mxu2 %v620_v10  ;;  %v832_v45 = vld [vmem:[#allocation10 + $0x28] sm:$0xff]  ;;  %v839_v46 = vld [vmem:[#allocation10 + $0x60] sm:$0xff]  ;;  %v838_v48 = vld [vmem:[#allocation10 + $0x58] sm:$0xff] }
  0x30   :  { %372 = vmatpush.bf16.msra.mxu3 %v684_v11  ;;  %v831_v47 = vld [vmem:[#allocation10 + $0x20] sm:$0xff]  ;;  %v106_v49 = vld [vmem:[#allocation7] sm:$0x3]  ;;  %v837_v50 = vld [vmem:[#allocation10 + $0x50] sm:$0xff] }
  0x31   :  { %385 = vmatpush.bf16.msrb.mxu0 %v624_v14  ;;  %v108_v51 = vperm.slane %v106_v49, 0  ;;  %v109_v52 = vperm.slane %v106_v49, 1  ;;  %v830_v63 = vld [vmem:[#allocation10 + $0x18] sm:$0xff]  ;;  %v836_v0 = vld [vmem:[#allocation10 + $0x48] sm:$0xff]  ;;  %v829_v1 = vld [vmem:[#allocation10 + $0x10] sm:$0xff] }
  0x32   :  { %398 = vmatpush.bf16.msrb.mxu1 %v688_v15  ;;  %v835_v2 = vld [vmem:[#allocation10 + $0x40] sm:$0xff]  ;;  %v828_v3 = vld [vmem:[#allocation10 + $0x8] sm:$0xff] }
  0x33   :  { %360 = vmatpush.bf16.msra.mxu2 %v612_v19  ;;  %v827_v4 = vld [vmem:[#allocation10] sm:$0xff] }
  0x34   :  { %373 = vmatpush.bf16.msra.mxu3 %v676_v23  ;;  %v188_v5 = vld [vmem:[%s1088_s4] sm:$0x3] }
  0x35   :  { %386 = vmatpush.bf16.msrb.mxu0 %v616_v24  ;;  %v191_v6 = vperm.slane %v188_v5, 1  ;;  %v190_v11 = vperm.slane %v188_v5, 0  ;;  %v853_v25 = vld [vmem:[%s1090_s6] ss:$0 sm:$0xff] }
  0x36   :  { %399 = vmatpush.bf16.msrb.mxu1 %v680_v27 }
  0x37   :  { %361 = vmatpush.bf16.msra.mxu2 %v604_v31 }
  0x38   :  { %374 = vmatpush.bf16.msra.mxu3 %v668_v35 }
  0x39   :  { %387 = vmatpush.bf16.msrb.mxu0 %v608_v36 }
  0x3a   :  { %400 = vmatpush.bf16.msrb.mxu1 %v672_v39 }
  0x3b   :  { %542 = vmatpush.bf16.msrb.mxu2 %v834_v41 }
  0x3c   :  { %555 = vmatpush.bf16.msrb.mxu3 %v842_v40 }
  0x3f   :  { %543 = vmatpush.bf16.msrb.mxu2 %v833_v43 }
  0x40   :  { %556 = vmatpush.bf16.msrb.mxu3 %v841_v42 }
  0x43   :  { %544 = vmatpush.bf16.msrb.mxu2 %v832_v45 }
  0x44   :  { %557 = vmatpush.bf16.msrb.mxu3 %v840_v44 }
  0x47   :  { %545 = vmatpush.bf16.msrb.mxu2 %v831_v47 }
  0x48   :  { %558 = vmatpush.bf16.msrb.mxu3 %v839_v46 }
  0x4b   :  { %546 = vmatpush.bf16.msrb.mxu2 %v830_v63 }
  0x4c   :  { %559 = vmatpush.bf16.msrb.mxu3 %v838_v48 }
  0x4f   :  { %547 = vmatpush.bf16.msrb.mxu2 %v829_v1 }
  0x50   :  { %560 = vmatpush.bf16.msrb.mxu3 %v837_v50 }
  0x53   :  { %548 = vmatpush.bf16.msrb.mxu2 %v828_v3 }
  0x54   :  { %561 = vmatpush.bf16.msrb.mxu3 %v836_v0 }
  0x57   :  { %549 = vmatpush.bf16.msrb.mxu2 %v827_v4 }
  0x58   :  { %562 = vmatpush.bf16.msrb.mxu3 %v835_v2 }
  0x99   :  { %v135_v53 = vpop.f32.mrf.mxu0 }
  0x9a   :  { %v136_v54 = vadd.f32 %v135_v53, %v108_v51  ;;  %v148_v55 = vpop.f32.mrf.mxu1 }
  0x9b   :  { %v149_v56 = vadd.f32 %v148_v55, %v109_v52 }
  0x9c   :  { %v152_v57 = vmax.f32 %v136_v54, 0.0 }
  0x9d   :  { %v153_v58 = vmax.f32 %v149_v56, 0.0 }
  0x9e   :  { %v154_v59 = vpack.c.bf16 %v152_v57, %v152_v57 }
  0x9f   :  { %v155_v60 = vpack.c.bf16 %v153_v58, %v153_v58 }
  0xa0   :  { %362 = vmatmul.bf16.vlgmr.msra.gmra.mxu2 %v154_v59  ;;  %388 = vmatmul.bf16.vlgmr.msrb.gmra.mxu0 %v154_v59 }
  0xa1   :  { %375 = vmatmul.bf16.vlgmr.msra.gmra.mxu3 %v155_v60  ;;  %401 = vmatmul.bf16.vlgmr.msrb.gmra.mxu1 %v155_v60  ;;  %v137_v61 = vpop.f32.mrf.mxu0 }
  0xa2   :  { %v150_v62 = vpop.f32.mrf.mxu1 }
 0x11d   :  { %v389_v7 = vpop.f32.mrf.mxu0 }
 0x11e   :  { %v390_v8 = vadd.f32 %v389_v7, %v191_v6  ;;  %v402_v9 = vpop.f32.mrf.mxu1 }
 0x120   :  { %v403_v10 = vadd.f32 %v402_v9, %v390_v8 }
 0x122   :  { %v407_v12 = vmax.f32 %v403_v10, 0.0 }
 0x123   :  { %v363_v13 = vpop.f32.mrf.mxu2 }
 0x124   :  { %v409_v14 = vpack.c.bf16 %v407_v12, %v407_v12  ;;  %v364_v15 = vadd.f32 %v363_v13, %v190_v11  ;;  %v376_v16 = vpop.f32.mrf.mxu3 }
 0x125   :  { %v391_v17 = vpop.f32.mrf.mxu0 }
 0x126   :  { %v377_v18 = vadd.f32 %v376_v16, %v364_v15  ;;  %v404_v19 = vpop.f32.mrf.mxu1  ;;  %563 = vmatmul.bf16.vlgmr.msrb.gmra.mxu3 %v409_v14 }
 0x128   :  { %v406_v20 = vmax.f32 %v377_v18, 0.0 }
 0x12a   :  { %v408_v21 = vpack.c.bf16 %v406_v20, %v406_v20 }
 0x12b   :  { %v365_v22 = vpop.f32.mrf.mxu2 }
 0x12c   :  { %v378_v23 = vpop.f32.mrf.mxu3  ;;  %550 = vmatmul.bf16.vlgmr.msrb.gmra.mxu2 %v408_v21 }
 0x1a9   :  { %v564_v24 = vpop.f32.mrf.mxu3 }
 0x1af   :  { %v551_v26 = vpop.f32.mrf.mxu2 }
 0x1b0   :  { %v552_v27 = vadd.f32 %v853_v25, %v551_v26 }
 0x1b1   :  { %v566_v28 = vpop.f32.mrf.mxu3 }
 0x1b2   :  { %v565_v29 = vadd.f32 %v564_v24, %v552_v27 }
 0x1b4   :  { %854 = vtanh.f32 %v565_v29 }
 0x1b7   :  { %v553_v30 = vpop.f32.mrf.mxu2 }
 0x1ba   :  { %v855_v31 = vpop.eup %854 }
 0x1bb   :  { %v569_v32 = vmul.f32 2.0, %v855_v31 }
 0x1bd   :  { %v570_v33 = vpack.c.bf16 %v569_v32, %v569_v32 }
 0x1bf   :  { %571 = vst [vmem:[#allocation11] sm:$0xf] %v570_v33 }
 0x1c0   :  { %582 = dma.vmem_to_hbm [thread:$0]  %s578_s29, 64, %s580_s9, [#allocation4]  }
 0x1c1   :  { %1006 = dma.done.wait [#allocation4], 64  }
 0x1c2   :  { %1007 = vsyncadd [#allocation4], 4294967232 }
 0x1c3   :  { %587 = vsyncpa [#allocation3], 1 }
 0x1c4   :  { %588 = vsyncpa [#allocation6], 1 }
 0x1c5   :  { %589 = vsyncpa [#allocation9], 1 }
 0x1c6   :  { %590 = vsyncpa [#allocation4], 1 }

</bundles_post_ra>
